<compile_context>
chip_gen: v5e
topology: v5e:2x2
jax: 0.10.0
libtpu: 0.0.40
codegen_flags: <defaults>
</compile_context>

<pallas_src>
import functools

import jax
import jax.numpy as jnp
from jax import lax
from jax.experimental import pallas as pl
from jax.experimental.pallas import tpu as pltpu

NEG_SLOPE = 0.2


def _phase_folded_weights(weight_oihw):
    """Fold the nearest-x2 upsample into the 3x3 conv weights.

    Returns wsub of shape (3, 3, Cin, 4*Cout): a 3x3 "sub-pixel" conv over the
    1-padded ORIGINAL input whose 4*Cout output channels are the (a, b) phases of
    the x2 output:
        y[2p+a, 2q+b, co] = sum_{uu,vv,ci} wsub[uu, vv, ci, (2a+b)*Cout + co]
                                           * x_pad[p+uu, q+vv, ci]
    """
    Cout, Cin = weight_oihw.shape[0], weight_oihw.shape[1]
    w_hwio = jnp.transpose(weight_oihw, (2, 3, 1, 0)).astype(jnp.float32)  # (3,3,Cin,Cout)
    wsub = jnp.zeros((3, 3, Cin, 2, 2, Cout), jnp.float32)
    for a in range(2):
        for b in range(2):
            for ky in range(3):
                for kx in range(3):
                    uu = (a + ky + 1) // 2   # padded-row offset this tap lands on
                    vv = (b + kx + 1) // 2   # padded-col offset this tap lands on
                    wsub = wsub.at[uu, vv, :, a, b, :].add(w_hwio[ky, kx])
    return wsub.reshape(3, 3, Cin, 4 * Cout)


def _banded_chunk_weights(wsub, Wc, Cin, Cout):
    """Band matrix so one MXU matmul emits a lane-dense chunk of Wc output pixel-pairs
    (all 4 phases, all Cout channels): shape (3, (Wc+2)*Cin, Wc*4*Cout)."""
    K, Nout = (Wc + 2) * Cin, Wc * 4 * Cout
    big = jnp.zeros((3, K, Nout), jnp.float32)
    for ql in range(Wc):
        for vv in range(3):
            jl = ql + vv
            big = big.at[:, jl * Cin:(jl + 1) * Cin,
                         ql * 4 * Cout:(ql + 1) * 4 * Cout].set(wsub[:, vv])
    return big


def _pick_chunk_width(W, Cout):
    """Smallest divisor of W whose output chunk (Wc*4*Cout lanes) reaches 128 lanes."""
    for wc in range(1, W + 1):
        if W % wc == 0 and wc * 4 * Cout >= 128:
            return wc
    return W


def _pick_row_tile(H):
    # Tunable. 8 keeps per-step blocks small (v7x-safe) and 8-aligned on sublanes.
    return 8 if (H % 8 == 0 and H > 8) else H


def _make_kernel(TH, W, Cin, Cout, Wc):
    K = (Wc + 2) * Cin
    Nout = Wc * 4 * Cout
    n_chunks = W // Wc   # NOTE: for very large W, move this loop onto a grid axis.

    def kernel(xw_ref, w_ref, b_ref, o_ref):
        # xw_ref: (1, 1, TH+2, (W+2)*Cin)  padded row-tile window, lane-flattened rows
        # w_ref : (3, K, Nout)             banded sub-pixel weights (resident in VMEM)
        # b_ref : (1, Nout)                bias replicated over pixels / phases
        # o_ref : (1, TH, W*4*Cout)        lane-dense sub-pixel output rows
        for qc in range(n_chunks):
            lane0 = qc * Wc * Cin
            acc = jnp.zeros((TH, Nout), jnp.float32)
            for uu in range(3):
                lhs = xw_ref[0, 0, uu:uu + TH, lane0:lane0 + K]        # (TH, K)
                acc = acc + jnp.dot(lhs, w_ref[uu],
                                    preferred_element_type=jnp.float32)
            acc = acc + b_ref[...]
            acc = jnp.where(acc > 0, acc, NEG_SLOPE * acc)             # LeakyReLU(0.2)
            o_ref[0, :, qc * Nout:(qc + 1) * Nout] = acc.astype(o_ref.dtype)

    return kernel


@functools.partial(jax.jit, static_argnames=("scale_factor",))
def upsample_block(x_nchw, weight_oihw, bias, scale_factor=2):
    """x_nchw: (N, C, H, W); weight_oihw: (Cout, Cin, 3, 3); bias: (Cout,).
    Returns (N, Cout, 2H, 2W)."""
    assert scale_factor == 2, "x2 nearest upsample is folded into the weights"
    N, C, H, W = x_nchw.shape
    Cout = weight_oihw.shape[0]

    Wc = _pick_chunk_width(W, Cout)
    TH = _pick_row_tile(H)
    nT = H // TH
    K = (Wc + 2) * C
    Nout = Wc * 4 * Cout

    # Fold upsample into weights; band them so each matmul emits a lane-dense chunk.
    wsub = _phase_folded_weights(weight_oihw)
    big_w = _banded_chunk_weights(wsub, Wc, C, Cout)
    bias_row = jnp.tile(bias.astype(jnp.float32), Wc * 4).reshape(1, Nout)

    # NCHW -> NHWC, 1-pixel zero pad, lane-flatten rows, gather overlapping row tiles
    # (+2 halo rows). One small fused XLA pass over ORIGINAL-resolution data.
    x = jnp.transpose(x_nchw, (0, 2, 3, 1)).astype(jnp.float32)        # (N, H, W, C)
    xp = jnp.pad(x, ((0, 0), (1, 1), (1, 1), (0, 0)))                  # (N, H+2, W+2, C)
    xf = xp.reshape(N, H + 2, (W + 2) * C)
    xw = jnp.stack([xf[:, t * TH: t * TH + TH + 2, :] for t in range(nT)], axis=1)
    # xw: (N, nT, TH+2, (W+2)*C)

    out4 = pl.pallas_call(
        _make_kernel(TH, W, C, Cout, Wc),
        out_shape=jax.ShapeDtypeStruct((N, H, W * 4 * Cout), jnp.float32),
        grid=(N, nT),
        in_specs=[
            pl.BlockSpec((1, 1, TH + 2, (W + 2) * C), lambda n, t: (n, t, 0, 0)),
            pl.BlockSpec((3, K, Nout), lambda n, t: (0, 0, 0)),
            pl.BlockSpec((1, Nout), lambda n, t: (0, 0)),
        ],
        out_specs=pl.BlockSpec((1, TH, W * 4 * Cout), lambda n, t: (n, t, 0)),
        compiler_params=pltpu.CompilerParams(
            dimension_semantics=("parallel", "parallel"),
        ),
    )(xw, big_w, bias_row)

    # Depth-to-space + NHWC -> NCHW in one fused XLA copy pass.
    out = out4.reshape(N, H, W, 2, 2, Cout)                 # (n, p, q, a, b, co)
    out = jnp.transpose(out, (0, 5, 1, 3, 2, 4))            # (n, co, p, a, q, b)
    return out.reshape(N, Cout, 2 * H, 2 * W).astype(x_nchw.dtype)


def _reference(x_nchw, weight_oihw, bias, scale_factor=2):
    """Pure-JAX reference mirroring the PyTorch module."""
    xu = jnp.repeat(jnp.repeat(x_nchw, scale_factor, axis=2), scale_factor, axis=3)
    y = lax.conv_general_dilated(
        xu, weight_oihw, window_strides=(1, 1), padding="SAME",
        dimension_numbers=("NCHW", "OIHW", "NCHW"),
    ) + bias[None, :, None, None]
    return jnp.where(y > 0, y, NEG_SLOPE * y)


if __name__ == "__main__":
    key = jax.random.PRNGKey(0)
    k_x, k_w, k_b = jax.random.split(key, 3)

    N, C, H, W = 2, 4, 16, 16
    x = jax.random.normal(k_x, (N, C, H, W), dtype=jnp.float32)

    # Deterministic synthetic parameters (Conv2d(in_c, in_c, 3, 1, 1) shapes).
    fan_in = C * 3 * 3
    bound = 1.0 / jnp.sqrt(fan_in)
    weight = jax.random.uniform(k_w, (C, C, 3, 3), jnp.float32, -bound, bound)
    bias = jax.random.uniform(k_b, (C,), jnp.float32, -bound, bound)

    out = jax.block_until_ready(upsample_block(x, weight, bias, scale_factor=2))
    ref = jax.block_until_ready(_reference(x, weight, bias, scale_factor=2))

    assert out.shape == (N, C, 2 * H, 2 * W), out.shape
    max_err = float(jnp.max(jnp.abs(out - ref)))
    assert jnp.allclose(out, ref, atol=1e-3, rtol=1e-3), max_err

    print("KERNEL_OK")
</pallas_src>

<mosaic_0001>
module attributes {stable_mosaic.version = 11 : i64} {
  func.func @kernel(%arg0: i32, %arg1: i32, %arg2: memref<1x1x10x72xf32, #tpu.memory_space<vmem>>, %arg3: memref<3x40x128xf32, #tpu.memory_space<vmem>>, %arg4: memref<1x128xf32, #tpu.memory_space<vmem>>, %arg5: memref<1x8x256xf32, #tpu.memory_space<vmem>>) attributes {dimension_semantics = [#tpu.dimension_semantics<parallel>, #tpu.dimension_semantics<parallel>], iteration_bounds = array<i64: 2, 2>, scalar_prefetch = 0 : i64, scratch_operands = 0 : i64, tpu.core_type = #tpu.core_type<tc>, window_params = [{transform_indices = @transform_0, window_bounds = array<i64: 1, 1, 10, 72>}, {pipeline_mode = #tpu.pipeline_mode<synchronous>, transform_indices = @transform_1, window_bounds = array<i64: 3, 40, 128>}, {pipeline_mode = #tpu.pipeline_mode<synchronous>, transform_indices = @transform_2, window_bounds = array<i64: 1, 128>}, {transform_indices = @transform_3, window_bounds = array<i64: 1, 8, 256>}]} {
    %cst = arith.constant 0.000000e+00 : f32
    %0 = vector.broadcast %cst : f32 to vector<8x128xf32>
    %c0 = arith.constant 0 : index
    %c0_0 = arith.constant 0 : index
    %c0_1 = arith.constant 0 : index
    %c0_2 = arith.constant 0 : index
    %1 = vector.load %arg2[%c0, %c0_0, %c0_1, %c0_2] : memref<1x1x10x72xf32, #tpu.memory_space<vmem>>, vector<1x1x8x40xf32>
    %2 = vector.shape_cast %1 : vector<1x1x8x40xf32> to vector<8x40xf32>
    %c0_3 = arith.constant 0 : index
    %c0_4 = arith.constant 0 : index
    %c0_5 = arith.constant 0 : index
    %3 = vector.load %arg3[%c0_3, %c0_4, %c0_5] : memref<3x40x128xf32, #tpu.memory_space<vmem>>, vector<1x40x128xf32>
    %4 = vector.shape_cast %3 : vector<1x40x128xf32> to vector<40x128xf32>
    %cst_6 = arith.constant dense<0.000000e+00> : vector<8x128xf32>
    %5 = tpu.matmul %2, %4, %cst_6 {dimension_numbers = #tpu.dot_dimension_numbers<[1], [0], [0], [1], [0, 0, 1, 1], [], []>} : vector<8x40xf32>, vector<40x128xf32>, vector<8x128xf32> -> vector<8x128xf32>
    %6 = arith.addf %0, %5 : vector<8x128xf32>
    %c0_7 = arith.constant 0 : index
    %c0_8 = arith.constant 0 : index
    %c1 = arith.constant 1 : index
    %c0_9 = arith.constant 0 : index
    %7 = vector.load %arg2[%c0_7, %c0_8, %c1, %c0_9] : memref<1x1x10x72xf32, #tpu.memory_space<vmem>>, vector<1x1x8x40xf32>
    %8 = vector.shape_cast %7 : vector<1x1x8x40xf32> to vector<8x40xf32>
    %c1_10 = arith.constant 1 : index
    %c0_11 = arith.constant 0 : index
    %c0_12 = arith.constant 0 : index
    %9 = vector.load %arg3[%c1_10, %c0_11, %c0_12] : memref<3x40x128xf32, #tpu.memory_space<vmem>>, vector<1x40x128xf32>
    %10 = vector.shape_cast %9 : vector<1x40x128xf32> to vector<40x128xf32>
    %cst_13 = arith.constant dense<0.000000e+00> : vector<8x128xf32>
    %11 = tpu.matmul %8, %10, %cst_13 {dimension_numbers = #tpu.dot_dimension_numbers<[1], [0], [0], [1], [0, 0, 1, 1], [], []>} : vector<8x40xf32>, vector<40x128xf32>, vector<8x128xf32> -> vector<8x128xf32>
    %12 = arith.addf %6, %11 : vector<8x128xf32>
    %c0_14 = arith.constant 0 : index
    %c0_15 = arith.constant 0 : index
    %c2 = arith.constant 2 : index
    %c0_16 = arith.constant 0 : index
    %13 = vector.load %arg2[%c0_14, %c0_15, %c2, %c0_16] : memref<1x1x10x72xf32, #tpu.memory_space<vmem>>, vector<1x1x8x40xf32>
    %14 = vector.shape_cast %13 : vector<1x1x8x40xf32> to vector<8x40xf32>
    %c2_17 = arith.constant 2 : index
    %c0_18 = arith.constant 0 : index
    %c0_19 = arith.constant 0 : index
    %15 = vector.load %arg3[%c2_17, %c0_18, %c0_19] : memref<3x40x128xf32, #tpu.memory_space<vmem>>, vector<1x40x128xf32>
    %16 = vector.shape_cast %15 : vector<1x40x128xf32> to vector<40x128xf32>
    %cst_20 = arith.constant dense<0.000000e+00> : vector<8x128xf32>
    %17 = tpu.matmul %14, %16, %cst_20 {dimension_numbers = #tpu.dot_dimension_numbers<[1], [0], [0], [1], [0, 0, 1, 1], [], []>} : vector<8x40xf32>, vector<40x128xf32>, vector<8x128xf32> -> vector<8x128xf32>
    %18 = arith.addf %12, %17 : vector<8x128xf32>
    %c0_21 = arith.constant 0 : index
    %c0_22 = arith.constant 0 : index
    %19 = vector.load %arg4[%c0_21, %c0_22] : memref<1x128xf32, #tpu.memory_space<vmem>>, vector<1x128xf32>
    %20 = vector.broadcast %19 : vector<1x128xf32> to vector<8x128xf32>
    %21 = arith.addf %18, %20 : vector<8x128xf32>
    %cst_23 = arith.constant 0.000000e+00 : f32
    %22 = vector.broadcast %cst_23 : f32 to vector<8x128xf32>
    %23 = arith.cmpf ogt, %21, %22 : vector<8x128xf32>
    %cst_24 = arith.constant 2.000000e-01 : f32
    %24 = vector.broadcast %cst_24 : f32 to vector<8x128xf32>
    %25 = arith.mulf %24, %21 : vector<8x128xf32>
    %26 = arith.select %23, %21, %25 : vector<8x128xi1>, vector<8x128xf32>
    %c0_25 = arith.constant 0 : index
    %c0_26 = arith.constant 0 : index
    %c0_27 = arith.constant 0 : index
    %27 = vector.load %arg5[%c0_25, %c0_26, %c0_27] : memref<1x8x256xf32, #tpu.memory_space<vmem>>, vector<1x8x128xf32>
    %28 = vector.shape_cast %27 : vector<1x8x128xf32> to vector<8x128xf32>
    %29 = vector.shape_cast %26 : vector<8x128xf32> to vector<1x8x128xf32>
    tpu.vector_store %arg5[%c0_25, %c0_26, %c0_27], %29 {strides = array<i32>} : memref<1x8x256xf32, #tpu.memory_space<vmem>>, vector<1x8x128xf32>,
    %cst_28 = arith.constant 0.000000e+00 : f32
    %30 = vector.broadcast %cst_28 : f32 to vector<8x128xf32>
    %c0_29 = arith.constant 0 : index
    %c0_30 = arith.constant 0 : index
    %c0_31 = arith.constant 0 : index
    %c32 = arith.constant 32 : index
    %31 = vector.load %arg2[%c0_29, %c0_30, %c0_31, %c32] : memref<1x1x10x72xf32, #tpu.memory_space<vmem>>, vector<1x1x8x40xf32>
    %32 = vector.shape_cast %31 : vector<1x1x8x40xf32> to vector<8x40xf32>
    %c0_32 = arith.constant 0 : index
    %c0_33 = arith.constant 0 : index
    %c0_34 = arith.constant 0 : index
    %33 = vector.load %arg3[%c0_32, %c0_33, %c0_34] : memref<3x40x128xf32, #tpu.memory_space<vmem>>, vector<1x40x128xf32>
    %34 = vector.shape_cast %33 : vector<1x40x128xf32> to vector<40x128xf32>
    %cst_35 = arith.constant dense<0.000000e+00> : vector<8x128xf32>
    %35 = tpu.matmul %32, %34, %cst_35 {dimension_numbers = #tpu.dot_dimension_numbers<[1], [0], [0], [1], [0, 0, 1, 1], [], []>} : vector<8x40xf32>, vector<40x128xf32>, vector<8x128xf32> -> vector<8x128xf32>
    %36 = arith.addf %30, %35 : vector<8x128xf32>
    %c0_36 = arith.constant 0 : index
    %c0_37 = arith.constant 0 : index
    %c1_38 = arith.constant 1 : index
    %c32_39 = arith.constant 32 : index
    %37 = vector.load %arg2[%c0_36, %c0_37, %c1_38, %c32_39] : memref<1x1x10x72xf32, #tpu.memory_space<vmem>>, vector<1x1x8x40xf32>
    %38 = vector.shape_cast %37 : vector<1x1x8x40xf32> to vector<8x40xf32>
    %c1_40 = arith.constant 1 : index
    %c0_41 = arith.constant 0 : index
    %c0_42 = arith.constant 0 : index
    %39 = vector.load %arg3[%c1_40, %c0_41, %c0_42] : memref<3x40x128xf32, #tpu.memory_space<vmem>>, vector<1x40x128xf32>
    %40 = vector.shape_cast %39 : vector<1x40x128xf32> to vector<40x128xf32>
    %cst_43 = arith.constant dense<0.000000e+00> : vector<8x128xf32>
    %41 = tpu.matmul %38, %40, %cst_43 {dimension_numbers = #tpu.dot_dimension_numbers<[1], [0], [0], [1], [0, 0, 1, 1], [], []>} : vector<8x40xf32>, vector<40x128xf32>, vector<8x128xf32> -> vector<8x128xf32>
    %42 = arith.addf %36, %41 : vector<8x128xf32>
    %c0_44 = arith.constant 0 : index
    %c0_45 = arith.constant 0 : index
    %c2_46 = arith.constant 2 : index
    %c32_47 = arith.constant 32 : index
    %43 = vector.load %arg2[%c0_44, %c0_45, %c2_46, %c32_47] : memref<1x1x10x72xf32, #tpu.memory_space<vmem>>, vector<1x1x8x40xf32>
    %44 = vector.shape_cast %43 : vector<1x1x8x40xf32> to vector<8x40xf32>
    %c2_48 = arith.constant 2 : index
    %c0_49 = arith.constant 0 : index
    %c0_50 = arith.constant 0 : index
    %45 = vector.load %arg3[%c2_48, %c0_49, %c0_50] : memref<3x40x128xf32, #tpu.memory_space<vmem>>, vector<1x40x128xf32>
    %46 = vector.shape_cast %45 : vector<1x40x128xf32> to vector<40x128xf32>
    %cst_51 = arith.constant dense<0.000000e+00> : vector<8x128xf32>
    %47 = tpu.matmul %44, %46, %cst_51 {dimension_numbers = #tpu.dot_dimension_numbers<[1], [0], [0], [1], [0, 0, 1, 1], [], []>} : vector<8x40xf32>, vector<40x128xf32>, vector<8x128xf32> -> vector<8x128xf32>
    %48 = arith.addf %42, %47 : vector<8x128xf32>
    %c0_52 = arith.constant 0 : index
    %c0_53 = arith.constant 0 : index
    %49 = vector.load %arg4[%c0_52, %c0_53] : memref<1x128xf32, #tpu.memory_space<vmem>>, vector<1x128xf32>
    %50 = vector.broadcast %49 : vector<1x128xf32> to vector<8x128xf32>
    %51 = arith.addf %48, %50 : vector<8x128xf32>
    %cst_54 = arith.constant 0.000000e+00 : f32
    %52 = vector.broadcast %cst_54 : f32 to vector<8x128xf32>
    %53 = arith.cmpf ogt, %51, %52 : vector<8x128xf32>
    %cst_55 = arith.constant 2.000000e-01 : f32
    %54 = vector.broadcast %cst_55 : f32 to vector<8x128xf32>
    %55 = arith.mulf %54, %51 : vector<8x128xf32>
    %56 = arith.select %53, %51, %55 : vector<8x128xi1>, vector<8x128xf32>
    %c0_56 = arith.constant 0 : index
    %c0_57 = arith.constant 0 : index
    %c128 = arith.constant 128 : index
    %57 = vector.load %arg5[%c0_56, %c0_57, %c128] : memref<1x8x256xf32, #tpu.memory_space<vmem>>, vector<1x8x128xf32>
    %58 = vector.shape_cast %57 : vector<1x8x128xf32> to vector<8x128xf32>
    %59 = vector.shape_cast %56 : vector<8x128xf32> to vector<1x8x128xf32>
    tpu.vector_store %arg5[%c0_56, %c0_57, %c128], %59 {strides = array<i32>} : memref<1x8x256xf32, #tpu.memory_space<vmem>>, vector<1x8x128xf32>,
    return
  }
  func.func @transform_0(%arg0: i32, %arg1: i32) -> (i32, i32, i32, i32) {
    %c0_i32 = arith.constant 0 : i32
    %c0_i32_0 = arith.constant 0 : i32
    %c0_i32_1 = arith.constant 0 : i32
    return %arg0, %arg1, %c0_i32, %c0_i32_0 : i32, i32, i32, i32
  }
  func.func @transform_1(%arg0: i32, %arg1: i32) -> (i32, i32, i32) {
    %c0_i32 = arith.constant 0 : i32
    %c0_i32_0 = arith.constant 0 : i32
    %c0_i32_1 = arith.constant 0 : i32
    %c0_i32_2 = arith.constant 0 : i32
    return %c0_i32, %c0_i32_0, %c0_i32_1 : i32, i32, i32
  }
  func.func @transform_2(%arg0: i32, %arg1: i32) -> (i32, i32) {
    %c0_i32 = arith.constant 0 : i32
    %c0_i32_0 = arith.constant 0 : i32
    %c0_i32_1 = arith.constant 0 : i32
    return %c0_i32, %c0_i32_0 : i32, i32
  }
  func.func @transform_3(%arg0: i32, %arg1: i32) -> (i32, i32, i32) {
    %c0_i32 = arith.constant 0 : i32
    %c0_i32_0 = arith.constant 0 : i32
    return %arg0, %arg1, %c0_i32 : i32, i32, i32
  }
}

</mosaic_0001>

<bundles_post_ra>
// kernel: tile.8
= control target key start
LH: loop header
LB: loop body
LE: loop exit
PB: predicated region body
PF: predicated region fallthrough
CT: control target
= control target key end

     0   :  { %s40_s0 = inlined_call_operand.vmem [shape: f32[4], index: 0, kind: input, shape index: {}]   ;;  %s41_s1 = inlined_call_operand.vmem [shape: f32[32,4], index: 1, kind: output, shape index: {}]  }
   0x1   :  { %v4_v0 = vld [vmem:[%s40_s0] ss:$0 sm:$0xff] }
   0x2   :  { %5 = vst [vmem:[%s41_s1] sm:$0xff] %v4_v0 }
   0x3   :  { %12 = vst [vmem:[%s41_s1 + $0x8] sm:$0xff] %v4_v0 }
   0x4   :  { %13 = vst [vmem:[%s41_s1 + $0x10] sm:$0xff] %v4_v0 }
   0x5   :  { %14 = vst [vmem:[%s41_s1 + $0x18] sm:$0xff] %v4_v0 }

// kernel: tile.9
= control target key start
LH: loop header
LB: loop body
LE: loop exit
PB: predicated region body
PF: predicated region fallthrough
CT: control target
= control target key end

     0   :  { %s259_s10 = smov 124   ;;  %s260_s11 = smov 116   ;;  %vm3_vm0 = vcmask 31744   ;;  %vm9_vm1 = vcmask 1048544   ;;  %vm15_vm2 = vcmask 1015744   ;;  %vm21_vm3 = vcmask 982944   ;;  %s399_s0 = inlined_call_operand.vmem [shape: f32[32,4], index: 0, kind: input, shape index: {}]   ;;  %s400_s1 = inlined_call_operand.vmem [shape: f32[1,128], index: 1, kind: output, shape index: {}]  }
   0x1   :  { %v197_v0 = vld [vmem:[%s399_s0 + $0x1f] sm:$0x1]   ;;  %v199_v1 = vld [vmem:[%s399_s0 + $0x1d] sm:$0x1]   ;;  %v201_v2 = vld [vmem:[%s399_s0 + $0x1b] sm:$0x1]  }
   0x2   :  { %7 = vrot.lane.b32.xlu0 %v197_v0, %s259_s10  ;;  %19 = vrot.lane.b32.xlu1 %v199_v1, %s260_s11  ;;  %s261_s14 = smov 108   ;;  %v198_v3 = vld [vmem:[%s399_s0 + $0x1e] sm:$0x1]   ;;  %v200_v4 = vld [vmem:[%s399_s0 + $0x1c] sm:$0x1]   ;;  %s262_s19 = smov 120  }
   0x3   :  { %31 = vrot.lane.b32.xlu2 %v201_v2, %s261_s14  ;;  %s263_s20 = smov 112   ;;  %v202_v5 = vld [vmem:[%s399_s0 + $0x1a] sm:$0x1]   ;;  %s264_s23 = smov 104   ;;  %v203_v6 = vld [vmem:[%s399_s0 + $0x19] sm:$0x1]  }
   0x4   :  { %v204_v7 = vld [vmem:[%s399_s0 + $0x18] sm:$0x1]   ;;  %s265_s28 = smov 100   ;;  %s266_s29 = smov 96   ;;  %v205_v8 = vld [vmem:[%s399_s0 + $0x17] sm:$0x1]  }
   0x5   :  { %s267_s3 = smov 92   ;;  %v206_v9 = vld [vmem:[%s399_s0 + $0x16] sm:$0x1]   ;;  %v207_v10 = vld [vmem:[%s399_s0 + $0x15] sm:$0x1]   ;;  %s268_s8 = smov 88  }
   0x6   :  { %s269_s9 = smov 84   ;;  %v208_v11 = vld [vmem:[%s399_s0 + $0x14] sm:$0x1]   ;;  %s270_s12 = smov 80   ;;  %v209_v12 = vld [vmem:[%s399_s0 + $0x13] sm:$0x1]  }
   0x7   :  { %v210_v13 = vld [vmem:[%s399_s0 + $0x12] sm:$0x1]   ;;  %s271_s17 = smov 76   ;;  %s272_s18 = smov 72   ;;  %v211_v14 = vld [vmem:[%s399_s0 + $0x11] sm:$0x1]  }
   0x8   :  { %s273_s21 = smov 68   ;;  %v212_v15 = vld [vmem:[%s399_s0 + $0x10] sm:$0x1]   ;;  %v213_v16 = vld [vmem:[%s399_s0 + $0xf] sm:$0x1]   ;;  %s274_s26 = smov 64  }
   0x9   :  { %s275_s27 = smov 60   ;;  %v214_v17 = vld [vmem:[%s399_s0 + $0xe] sm:$0x1]   ;;  %s276_s30 = smov 56   ;;  %v215_v18 = vld [vmem:[%s399_s0 + $0xd] sm:$0x1]  }
   0xa   :  { %13 = vrot.lane.b32.xlu0 %v198_v3, %s262_s19  ;;  %25 = vrot.lane.b32.xlu1 %v200_v4, %s263_s20  ;;  %v216_v19 = vld [vmem:[%s399_s0 + $0xc] sm:$0x1]   ;;  %s277_s6 = smov 52   ;;  %s278_s7 = smov 48   ;;  %v217_v20 = vld [vmem:[%s399_s0 + $0xb] sm:$0x1]  }
   0xb   :  { %37 = vrot.lane.b32.xlu2 %v202_v5, %s264_s23  ;;  %s279_s10 = smov 44   ;;  %v218_v21 = vld [vmem:[%s399_s0 + $0xa] sm:$0x1]   ;;  %v219_v22 = vld [vmem:[%s399_s0 + $0x9] sm:$0x1]   ;;  %s280_s15 = smov 40  }
   0xc   :  { %s281_s16 = smov 36   ;;  %v220_v23 = vld [vmem:[%s399_s0 + $0x8] sm:$0x1]   ;;  %s282_s19 = smov 32   ;;  %v221_v24 = vld [vmem:[%s399_s0 + $0x7] sm:$0x1]  }
   0xd   :  { %v222_v25 = vld [vmem:[%s399_s0 + $0x6] sm:$0x1]   ;;  %s283_s24 = smov 28   ;;  %s284_s25 = smov 24   ;;  %v223_v26 = vld [vmem:[%s399_s0 + $0x5] sm:$0x1]  }
   0xe   :  { %v224_v27 = vld [vmem:[%s399_s0 + $0x4] sm:$0x1]   ;;  %v225_v28 = vld [vmem:[%s399_s0 + $0x3] sm:$0x1]   ;;  %s286_s4 = smov 16   ;;  %s287_s5 = smov 12  }
   0xf   :  { %v226_v29 = vld [vmem:[%s399_s0 + $0x2] sm:$0x1]   ;;  %v227_v30 = vld [vmem:[%s399_s0 + $0x1] sm:$0x1]   ;;  %s289_s11 = smov 4   ;;  %vm27_vm4 = vcmask 950144  }
  0x10   :  { %v2_v31 = vld [vmem:[%s399_s0] sm:$0x1]   ;;  %vm33_vm5 = vcmask 917344   ;;  %vm39_vm6 = vcmask 884544   ;;  %vm45_vm7 = vcmask 851744   ;;  %vm51_vm8 = vcmask 818944  }
  0x11   :  { %4 = vst.msk [vmem:[#allocation0] sm:$0x1] %vm3_vm0, %v2_v31   ;;  %vm57_vm9 = vcmask 786144   ;;  %vm63_vm10 = vcmask 753344   ;;  %vm69_vm11 = vcmask 720544   ;;  %vm75_vm12 = vcmask 687744  }
  0x12   :  { %43 = vrot.lane.b32.xlu0 %v203_v6, %s265_s28  ;;  %49 = vrot.lane.b32.xlu1 %v204_v7, %s266_s29  ;;  %s285_s28 = smov 20   ;;  %vm81_vm13 = vcmask 654944   ;;  %vm87_vm14 = vcmask 622144   ;;  %vm93_vm15 = vcmask 589344   ;;  %vm99_vm0 = vcmask 556544  }
  0x13   :  { %55 = vrot.lane.b32.xlu2 %v205_v8, %s267_s3 }
  0x1a   :  { %61 = vrot.lane.b32.xlu0 %v206_v9, %s268_s8  ;;  %67 = vrot.lane.b32.xlu1 %v207_v10, %s269_s9  ;;  %s288_s8 = smov 8  }
  0x1b   :  { %73 = vrot.lane.b32.xlu2 %v208_v11, %s270_s12 }
  0x22   :  { %79 = vrot.lane.b32.xlu0 %v209_v12, %s271_s17  ;;  %85 = vrot.lane.b32.xlu1 %v210_v13, %s272_s18 }
  0x23   :  { %91 = vrot.lane.b32.xlu2 %v211_v14, %s273_s21 }
  0x2a   :  { %97 = vrot.lane.b32.xlu0 %v212_v15, %s274_s26  ;;  %103 = vrot.lane.b32.xlu1 %v213_v16, %s275_s27 }
  0x2b   :  { %109 = vrot.lane.b32.xlu2 %v214_v17, %s276_s30 }
  0x32   :  { %115 = vrot.lane.b32.xlu0 %v215_v18, %s277_s6  ;;  %121 = vrot.lane.b32.xlu1 %v216_v19, %s278_s7 }
  0x33   :  { %127 = vrot.lane.b32.xlu2 %v217_v20, %s279_s10 }
  0x3a   :  { %133 = vrot.lane.b32.xlu0 %v218_v21, %s280_s15  ;;  %139 = vrot.lane.b32.xlu1 %v219_v22, %s281_s16 }
  0x3b   :  { %145 = vrot.lane.b32.xlu2 %v220_v23, %s282_s19 }
  0x42   :  { %151 = vrot.lane.b32.xlu0 %v221_v24, %s283_s24  ;;  %157 = vrot.lane.b32.xlu1 %v222_v25, %s284_s25 }
  0x43   :  { %163 = vrot.lane.b32.xlu2 %v223_v26, %s285_s28 }
  0x4a   :  { %169 = vrot.lane.b32.xlu0 %v224_v27, %s286_s4  ;;  %175 = vrot.lane.b32.xlu1 %v225_v28, %s287_s5 }
  0x4b   :  { %181 = vrot.lane.b32.xlu2 %v226_v29, %s288_s8 }
  0x52   :  { %187 = vrot.lane.b32.xlu0 %v227_v30, %s289_s11 }
  0x5d   :  { %v32_v32 = vpop.permute.xlu2 %31  }
  0x65   :  { %v38_v33 = vpop.permute.xlu2 %37  }
  0x6d   :  { %v56_v34 = vpop.permute.xlu2 %55  }
  0x74   :  { %v8_v35 = vpop.permute.xlu0 %7   ;;  %v20_v36 = vpop.permute.xlu1 %19  }
  0x75   :  { %10 = vst.msk [vmem:[#allocation0] sm:$0x1] %vm9_vm1, %v8_v35   ;;  %v74_v37 = vpop.permute.xlu2 %73   ;;  %vm105_vm1 = vcmask 523744  }
  0x7c   :  { %v14_v38 = vpop.permute.xlu0 %13   ;;  %v26_v39 = vpop.permute.xlu1 %25  }
  0x7d   :  { %16 = vst.msk [vmem:[#allocation0] sm:$0x1] %vm15_vm2, %v14_v38   ;;  %v92_v40 = vpop.permute.xlu2 %91   ;;  %vm111_vm2 = vcmask 490944  }
  0x7e   :  { %22 = vst.msk [vmem:[#allocation0] sm:$0x1] %vm21_vm3, %v20_v36   ;;  %vm117_vm3 = vcmask 458144  }
  0x7f   :  { %28 = vst.msk [vmem:[#allocation0] sm:$0x1] %vm27_vm4, %v26_v39   ;;  %vm123_vm4 = vcmask 425344  }
  0x80   :  { %34 = vst.msk [vmem:[#allocation0] sm:$0x1] %vm33_vm5, %v32_v32   ;;  %vm129_vm5 = vcmask 392544  }
  0x81   :  { %40 = vst.msk [vmem:[#allocation0] sm:$0x1] %vm39_vm6, %v38_v33   ;;  %vm135_vm6 = vcmask 359744  }
  0x84   :  { %v44_v41 = vpop.permute.xlu0 %43   ;;  %v50_v42 = vpop.permute.xlu1 %49  }
  0x85   :  { %46 = vst.msk [vmem:[#allocation0] sm:$0x1] %vm45_vm7, %v44_v41   ;;  %v110_v43 = vpop.permute.xlu2 %109   ;;  %vm141_vm7 = vcmask 326944  }
  0x86   :  { %52 = vst.msk [vmem:[#allocation0] sm:$0x1] %vm51_vm8, %v50_v42   ;;  %vm147_vm8 = vcmask 294144  }
  0x87   :  { %58 = vst.msk [vmem:[#allocation0] sm:$0x1] %vm57_vm9, %v56_v34   ;;  %vm153_vm9 = vcmask 261344  }
  0x8c   :  { %v62_v44 = vpop.permute.xlu0 %61   ;;  %v68_v45 = vpop.permute.xlu1 %67  }
  0x8d   :  { %64 = vst.msk [vmem:[#allocation0] sm:$0x1] %vm63_vm10, %v62_v44   ;;  %v128_v46 = vpop.permute.xlu2 %127   ;;  %vm159_vm10 = vcmask 228544  }
  0x8e   :  { %70 = vst.msk [vmem:[#allocation0] sm:$0x1] %vm69_vm11, %v68_v45   ;;  %vm165_vm11 = vcmask 195744  }
  0x8f   :  { %76 = vst.msk [vmem:[#allocation0] sm:$0x1] %vm75_vm12, %v74_v37   ;;  %vm171_vm12 = vcmask 162944  }
  0x94   :  { %v80_v47 = vpop.permute.xlu0 %79   ;;  %v86_v48 = vpop.permute.xlu1 %85  }
  0x95   :  { %82 = vst.msk [vmem:[#allocation0] sm:$0x1] %vm81_vm13, %v80_v47   ;;  %v146_v49 = vpop.permute.xlu2 %145   ;;  %vm177_vm13 = vcmask 130144  }
  0x96   :  { %88 = vst.msk [vmem:[#allocation0] sm:$0x1] %vm87_vm14, %v86_v48   ;;  %vm183_vm14 = vcmask 97344  }
  0x97   :  { %94 = vst.msk [vmem:[#allocation0] sm:$0x1] %vm93_vm15, %v92_v40   ;;  %vm189_vm15 = vcmask 64544  }
  0x9c   :  { %v98_v50 = vpop.permute.xlu0 %97   ;;  %v104_v51 = vpop.permute.xlu1 %103  }
  0x9d   :  { %100 = vst.msk [vmem:[#allocation0] sm:$0x1] %vm99_vm0, %v98_v50   ;;  %v164_v52 = vpop.permute.xlu2 %163  }
  0x9e   :  { %106 = vst.msk [vmem:[#allocation0] sm:$0x1] %vm105_vm1, %v104_v51  }
  0x9f   :  { %112 = vst.msk [vmem:[#allocation0] sm:$0x1] %vm111_vm2, %v110_v43  }
  0xa4   :  { %v116_v53 = vpop.permute.xlu0 %115   ;;  %v122_v54 = vpop.permute.xlu1 %121  }
  0xa5   :  { %118 = vst.msk [vmem:[#allocation0] sm:$0x1] %vm117_vm3, %v116_v53   ;;  %v182_v55 = vpop.permute.xlu2 %181  }
  0xa6   :  { %124 = vst.msk [vmem:[#allocation0] sm:$0x1] %vm123_vm4, %v122_v54  }
  0xa7   :  { %130 = vst.msk [vmem:[#allocation0] sm:$0x1] %vm129_vm5, %v128_v46  }
  0xac   :  { %v134_v56 = vpop.permute.xlu0 %133   ;;  %v140_v57 = vpop.permute.xlu1 %139  }
  0xad   :  { %136 = vst.msk [vmem:[#allocation0] sm:$0x1] %vm135_vm6, %v134_v56  }
  0xae   :  { %142 = vst.msk [vmem:[#allocation0] sm:$0x1] %vm141_vm7, %v140_v57  }
  0xaf   :  { %148 = vst.msk [vmem:[#allocation0] sm:$0x1] %vm147_vm8, %v146_v49  }
  0xb4   :  { %v152_v58 = vpop.permute.xlu0 %151   ;;  %v158_v59 = vpop.permute.xlu1 %157  }
  0xb5   :  { %154 = vst.msk [vmem:[#allocation0] sm:$0x1] %vm153_vm9, %v152_v58  }
  0xb6   :  { %160 = vst.msk [vmem:[#allocation0] sm:$0x1] %vm159_vm10, %v158_v59  }
  0xb7   :  { %166 = vst.msk [vmem:[#allocation0] sm:$0x1] %vm165_vm11, %v164_v52  }
  0xbc   :  { %v170_v60 = vpop.permute.xlu0 %169   ;;  %v176_v61 = vpop.permute.xlu1 %175  }
  0xbd   :  { %172 = vst.msk [vmem:[#allocation0] sm:$0x1] %vm171_vm12, %v170_v60  }
  0xbe   :  { %178 = vst.msk [vmem:[#allocation0] sm:$0x1] %vm177_vm13, %v176_v61  }
  0xbf   :  { %184 = vst.msk [vmem:[#allocation0] sm:$0x1] %vm183_vm14, %v182_v55  }
  0xc4   :  { %v188_v62 = vpop.permute.xlu0 %187  }
  0xc5   :  { %190 = vst.msk [vmem:[#allocation0] sm:$0x1] %vm189_vm15, %v188_v62  }
  0xcc   :  { %v193_v63 = vld [vmem:[#allocation0] sm:$0x1] }
  0xcd   :  { %196 = vst [vmem:[%s400_s1] sm:$0x1] %v193_v63 }

// kernel: upsample_block.1
= control target key start
LH: loop header
LB: loop body
LE: loop exit
PB: predicated region body
PF: predicated region fallthrough
CT: control target
= control target key end

     0   :  { %s648_s12 = smov 0   ;;  %s650_s13 = smov 0   ;;  %s769_s0 = inlined_call_operand.vmem [shape: f32[2,2,10,72], index: 0, kind: input, shape index: {}]   ;;  %s770_s1 = inlined_call_operand.vmem [shape: f32[3,40,128], index: 1, kind: input, shape index: {}]   ;;  %s771_s2 = inlined_call_operand.vmem [shape: f32[1,128], index: 2, kind: input, shape index: {}]   ;;  %s772_s3 = inlined_call_operand.vmem [shape: f32[2,16,256], index: 3, kind: output, shape index: {}]  }
   0x1   :  { %s652_s14 = smov 0   ;;  %s654_s15 = smov 0  }
   0x2   :  { %s656_s16 = smov 0  }
   0x3 LB: > { %s22_s17 = sadd.s32 1, %s617_s14  ;;  %s25_s18 = sadd.s32 1, %s621_s15  ;;  %s625_s16 = sphi %s656_s16, %s13_s16   ;;  %s621_s15 = sphi %s654_s15, %s776_s15   ;;  %s617_s14 = sphi %s652_s14, %s775_s14   ;;  %s613_s13 = sphi %s650_s13, %s774_s13   ;;  %s609_s12 = sphi %s648_s12, %s773_s12  }
   0x4   : > { %p23_p0 = scmp.ge.s32.totalorder %s22_s17, 2  ;;  %p509_p1 = scmp.ge.s32.totalorder %s625_s16, 1 }
   0x5   : > { %p157_p2 = scmp.lt.s32.totalorder %s625_s16, 5 }
   0x6   : > { %s778_s17 = smov (%p23_p0, %s22_s17), 0  ;;  %s780_s18 = smov (!%p23_p0, %s25_s18), %s621_s15 }
   0x7   : > { %p158_p3 = pnand %p509_p1, %p157_p2  ;;  %p27_p4 = scmp.ge.s32.totalorder %s780_s18, 2 }
   0x8   : > { %p189_p5 = scmp.lt.s32.totalorder (!%p158_p3), %s613_s13, 1  ;;  %p191_p6 = scmp.lt.s32.totalorder (!%p158_p3), %s609_s12, 1 }
   0x9   : > { %s782_s18 = smov (%p27_p4, %s780_s18), 0  ;;  %161 = sbr.rel (%p158_p3) target bundleno = 282 (0x11a), region = 32 }
   0xa   : > { %s627_s7 = smov (!%p158_p3), 96  }
   0xe   : > { %v527_v0 = vld [vmem:[%s770_s1 + $0x70] sm:$0xff]  ;;  %v526_v1 = vld [vmem:[%s770_s1 + $0x68] sm:$0xff]  ;;  %v212_v3 = vld [vmem:[%s770_s1 + $0x20] sm:$0xff]  ;;  %s784_s13 = smov (!%p189_p5, %s613_s13), 1  ;;  %s786_s12 = smov (!%p191_p6, %s609_s12), 1  ;;  %vm220_vm0 = vcmask 326656  }
   0xf   : > { %v520_v2 = vld [vmem:[%s770_s1 + $0x48] sm:$0xff]  ;;  %288 = vmatpush.msra.mxu2 %v527_v0  ;;  %v519_v4 = vld [vmem:[%s770_s1 + $0x40] sm:$0xff]  ;;  %258 = vmatpush.msra.mxu1 %v212_v3  ;;  %v211_v6 = vld [vmem:[%s770_s1 + $0x18] sm:$0xff]  ;;  %s511_s10 = sshll.u32 %s784_s13, 2  ;;  %s510_s22 = sshll.u32 %s786_s12, 1 }
  0x10   : > { %235 = vmatpush.msra.mxu0 %v520_v2  ;;  %v525_v5 = vld [vmem:[%s770_s1 + $0x60] sm:$0xff]  ;;  %335 = vmatpush.msra.mxu3 %v520_v2  ;;  %v518_v7 = vld [vmem:[%s770_s1 + $0x38] sm:$0xff]  ;;  %v210_v8 = vld [vmem:[%s770_s1 + $0x10] sm:$0xff]  ;;  %s720_s25 = sadd.s32 %s511_s10, %s510_s22 }
  0x11   : > { %289 = vmatpush.msra.mxu2 %v526_v1  ;;  %259 = vmatpush.msra.mxu1 %v211_v6  ;;  %v524_v9 = vld [vmem:[%s770_s1 + $0x58] sm:$0xff]  ;;  %v517_v10 = vld [vmem:[%s770_s1 + $0x30] sm:$0xff]  ;;  %v209_v11 = vld [vmem:[%s770_s1 + $0x8] sm:$0xff]  ;;  %s512_s12 = sshll.u32 %s720_s25, 3 }
  0x12   : > { %236 = vmatpush.msra.mxu0 %v519_v4  ;;  %336 = vmatpush.msra.mxu3 %v519_v4  ;;  %v523_v12 = vld [vmem:[%s770_s1 + $0x50] sm:$0xff]  ;;  %v516_v13 = vld [vmem:[%s770_s1 + $0x28] sm:$0xff]  ;;  %s197_s4 = scalar_lea.vmem %s769_s0, %s512_s12  ;;  %v208_v14 = vld [vmem:[%s770_s1] sm:$0xff]  ;;  %s206_s19 = scalar_lea.vmem %s772_s3, %s512_s12 }
  0x13   : > { %290 = vmatpush.msra.mxu2 %v525_v5  ;;  %260 = vmatpush.msra.mxu1 %v210_v8  ;;  %v313_v15 = vld [vmem:[%s197_s4 + $0x1] sm:$0xff]  ;;  %v585_v24 = vld [vmem:[%s771_s2] ss:$0 sm:$0xff] }
  0x14   : > { %237 = vmatpush.msra.mxu0 %v518_v7  ;;  %337 = vmatpush.msra.mxu3 %v518_v7  ;;  %v369_v16 = vld [vmem:[%s197_s4 + $0x2] sm:$0xff]  ;;  %v586_v34 = vld [vmem:[%s771_s2] ss:$0 sm:$0xff] }
  0x15   : > { %291 = vmatpush.msra.mxu2 %v524_v9  ;;  %261 = vmatpush.msra.mxu1 %v209_v11  ;;  %v307_v17 = vld [vmem:[%s197_s4] sm:$0xff] }
  0x16   : > { %238 = vmatpush.msra.mxu0 %v517_v10  ;;  %338 = vmatpush.msra.mxu3 %v517_v10 }
  0x17   : > { %292 = vmatpush.msra.mxu2 %v523_v12  ;;  %320 = vrot.lane.b32.xlu0 %v313_v15, %s627_s7 }
  0x18   : > { %239 = vmatpush.msra.mxu0 %v516_v13  ;;  %376 = vrot.lane.b32.xlu1 %v369_v16, %s627_s7 }
  0x19   : > { %528 = vmatmul.msk.f32.vlgmr.msra.gmra.mxu2 %vm220_vm0, %v369_v16  ;;  %262 = vmatpush.msra.mxu1 %v208_v14 }
  0x1a   : > { %521 = vmatmul.msk.f32.vlgmr.msra.gmra.mxu0 %vm220_vm0, %v313_v15  ;;  %522 = vmatmul.msk.f32.vlgmr.msra.gmra.mxu1 %vm220_vm0, %v307_v17 }
  0x1b   : > { %339 = vmatpush.msra.mxu3 %v516_v13  ;;  %360 = vmatpush.msrb.mxu0 %v212_v3 }
  0x1c   : > { %391 = vmatpush.msrb.mxu1 %v527_v0 }
  0x1d   : > { %361 = vmatpush.msrb.mxu0 %v211_v6 }
  0x1e   : > { %392 = vmatpush.msrb.mxu1 %v526_v1 }
  0x1f   : > { %362 = vmatpush.msrb.mxu0 %v210_v8  ;;  %345 = vrot.lane.b32.xlu0 %v307_v17, %s627_s7 }
  0x20   : > { %393 = vmatpush.msrb.mxu1 %v525_v5 }
  0x21   : > { %363 = vmatpush.msrb.mxu0 %v209_v11 }
  0x22   : > { %394 = vmatpush.msrb.mxu1 %v524_v9 }
  0x23   : > { %364 = vmatpush.msrb.mxu0 %v208_v14 }
  0x24   : > { %395 = vmatpush.msrb.mxu1 %v523_v12 }
  0x89   : > { %v321_v18 = vpop.permute.xlu0 %320 }
  0x8a   : > { %v377_v19 = vpop.permute.xlu1 %376  ;;  %534 = vmatmul.msk.f32.vlgmr.msra.gmra.mxu3 %vm220_vm0, %v321_v18 }
  0x8b   : > { %541 = vmatmul.msk.f32.vlgmr.msrb.gmra.mxu1 %vm220_vm0, %v377_v19 }
  0x91   : > { %v346_v20 = vpop.permute.xlu0 %345 }
  0x92   : > { %535 = vmatmul.msk.f32.vlgmr.msrb.gmra.mxu0 %vm220_vm0, %v346_v20 }
  0x97   : > { %v241_v21 = vpop.f32.mrf.mxu0  ;;  %v264_v22 = vpop.f32.mrf.mxu1 }
  0x98   : > { %v265_v23 = vadd.f32 %v264_v22, %v241_v21 }
  0x9c   : > { %v294_v25 = vpop.f32.mrf.mxu2 }
  0x9d   : > { %v297_v26 = vadd.f32 %v294_v25, %v265_v23 }
  0x9f   : > { %v302_v27 = vadd.f32 %v585_v24, %v297_v26 }
  0xa1   : > { %vm303_vm1 = vcmp.gt.f32.partialorder %v302_v27, 0.0  ;;  %v304_v28 = vmul.f32 0.2, %v302_v27 }
  0xa3   : > { %v305_v29 = vsel %vm303_vm1, %v302_v27, %v304_v28 }
  0xa4   : > { %306 = vst [vmem:[%s206_s19] sm:$0xff] %v305_v29 }
 0x108   : > { %v397_v30 = vpop.f32.mrf.mxu1 }
 0x10d   : > { %v341_v31 = vpop.f32.mrf.mxu3 }
 0x10f   : > { %v366_v32 = vpop.f32.mrf.mxu0 }
 0x110   : > { %v367_v33 = vadd.f32 %v366_v32, %v341_v31 }
 0x112   : > { %v400_v35 = vadd.f32 %v397_v30, %v367_v33 }
 0x114   : > { %v405_v36 = vadd.f32 %v586_v34, %v400_v35 }
 0x116   : > { %vm406_vm2 = vcmp.gt.f32.partialorder %v405_v36, 0.0  ;;  %v407_v37 = vmul.f32 0.2, %v405_v36 }
 0x118   : > { %v408_v38 = vsel %vm406_vm2, %v405_v36, %v407_v37 }
 0x119   : > { %409 = vst [vmem:[%s206_s19 + $0x8] sm:$0xff] %v408_v38 }
 0x11a PF: > { %s13_s16 = sadd.s32 1, %s625_s16   ;;  %s773_s12 = smov %s617_s14 }
 0x11b   : > { %p10_p7 = scmp.ge.s32.totalorder %s13_s16, 6   ;;  %s774_s13 = smov %s621_s15 }
 0x11c   : > { %s775_s14 = smov %s778_s17  ;;  %s776_s15 = smov %s782_s18 }
 0x11d   :  { %12 = sbr.rel (!%p10_p7) target bundleno = 3 (0x3), region = 64 }

</bundles_post_ra>
